<compile_context>
chip_gen: v7x
topology: tpu7x:2x2x1
jax: 0.10.0
libtpu: 0.0.40
codegen_flags: <defaults>
</compile_context>

<pallas_src>
import functools

import jax
import jax.numpy as jnp
from jax.experimental import pallas as pl
from jax.experimental.pallas import tpu as pltpu

LANE = 128      # lane width (last dim)
SUBLANE = 8     # sublane width (second-to-last dim)


def _round_up(x, m):
    return (x + m - 1) // m * m


def _cdiv(a, b):
    return -(-a // b)


# ----------------------------------------------------------------------------
# Fused kernel: x -> [Linear + ReLU] * (n-1) -> Linear -> out
# refs = (x_ref, w0, w1, ..., w_{n-1}, bias_stack_ref, o_ref)
# Activations stay as values (vregs); only the final result is stored.
# ----------------------------------------------------------------------------
def _decoder_kernel(*refs, n_layers, out_widths):
    x_ref = refs[0]
    b_ref = refs[1 + n_layers]
    o_ref = refs[-1]

    h = x_ref[...].astype(jnp.float32)
    for i in range(n_layers):
        w = refs[1 + i][...]                       # bf16 weight tile (VMEM-resident)
        po = out_widths[i]
        # bf16 MXU operands, f32 accumulation.
        h = jnp.dot(h.astype(w.dtype), w, preferred_element_type=jnp.float32)
        h = h + b_ref[i:i + 1, :po]                # f32 bias add (epilogue, VPU)
        if i < n_layers - 1:
            h = jnp.maximum(h, 0.0)                # ReLU fused, f32 (v5e-safe)
    o_ref[...] = h.astype(o_ref.dtype)


def _fused_decoder_call(xp, ws, b_all, out_widths, batch_tile):
    """xp: (Bp, F) input; ws: list of (pi, po) bf16 weights; b_all: (n, Wb) f32."""
    n_layers = len(ws)
    Bp, F = xp.shape
    out_w = out_widths[-1]
    grid = (Bp // batch_tile,)

    in_specs = [pl.BlockSpec((batch_tile, F), lambda i: (i, 0))]
    flat_args = [xp]
    for w in ws:
        pi, po = w.shape
        # Pinned to block (0,0): weights stay VMEM-resident across the grid.
        in_specs.append(pl.BlockSpec((pi, po), lambda i: (0, 0)))
        flat_args.append(w)
    in_specs.append(pl.BlockSpec(b_all.shape, lambda i: (0, 0)))
    flat_args.append(b_all)

    out_specs = pl.BlockSpec((batch_tile, out_w), lambda i: (i, 0))

    return pl.pallas_call(
        functools.partial(_decoder_kernel, n_layers=n_layers,
                          out_widths=out_widths),
        out_shape=jax.ShapeDtypeStruct((Bp, out_w), xp.dtype),
        grid_spec=pltpu.PrefetchScalarGridSpec(
            num_scalar_prefetch=0,
            grid=grid,
            in_specs=in_specs,
            out_specs=out_specs,
        ),
        compiler_params=pltpu.CompilerParams(
            dimension_semantics=("parallel",),     # shard batch across TCs (v7x)
            vmem_limit_bytes=32 * 1024 * 1024,     # within v7x scoped default
        ),
    )(*flat_args)


# ----------------------------------------------------------------------------
# Parameter handling
# ----------------------------------------------------------------------------
def init_decoder_params(key, output_size, intermediate_architecture, bottleneck_size):
    """Deterministic init mirroring nn.Linear default (uniform +-1/sqrt(fan_in)).

    Layer sizes follow the PyTorch module:
      Linear(bottleneck, arch[-1]),
      Linear(arch[::-1][i], arch[::-1][i+1]) for consecutive pairs,
      Linear(arch[0], output_size).
    Weights are stored transposed w.r.t. PyTorch, i.e. (in, out).
    """
    rev = intermediate_architecture[::-1]
    dims = [(bottleneck_size, rev[0])]
    for a, b in zip(rev[:-1], rev[1:]):
        dims.append((a, b))
    dims.append((intermediate_architecture[0], output_size))

    params = []
    for (fan_in, fan_out) in dims:
        key, kw, kb = jax.random.split(key, 3)
        bound = 1.0 / (fan_in ** 0.5)
        w = jax.random.uniform(kw, (fan_in, fan_out), jnp.float32, -bound, bound)
        b = jax.random.uniform(kb, (fan_out,), jnp.float32, -bound, bound)
        params.append((w, b))
    return params


def pad_decoder_params(params, weight_dtype=jnp.bfloat16):
    """Prepare kernel-side parameters.

    * First layer keeps its true fan_in (matches unpadded x feature width).
    * Hidden fan_outs are zero-padded to 128 (lane-dense, exact through ReLU:
      padded weight cols / bias entries are zero, so padded activation columns
      stay zero and feed zero rows of the next layer).
    * Last layer keeps its true fan_out so the kernel writes the real output
      width directly (no post-kernel slice).
    * Weights stored bf16 (MXU operands); biases stacked into one f32 array.
    Returns (weights_list, bias_stack, out_widths).
    """
    n = len(params)
    ws, out_widths = [], []
    for i, (w, b) in enumerate(params):
        fi, fo = w.shape
        pi = fi if i == 0 else _round_up(fi, LANE)
        po = fo if i == n - 1 else _round_up(fo, LANE)
        wp = jnp.zeros((pi, po), weight_dtype).at[:fi, :fo].set(
            w.astype(weight_dtype))
        ws.append(wp)
        out_widths.append(po)

    wb = _round_up(max(out_widths), LANE)
    b_all = jnp.zeros((n, wb), jnp.float32)
    for i, (_, b) in enumerate(params):
        b_all = b_all.at[i, :b.shape[0]].set(b)
    return ws, b_all, tuple(out_widths)


# ----------------------------------------------------------------------------
# Batch tiling: big DMA-efficient tiles, >=2 grid steps when possible (v7x),
# bounded batch padding for awkward sizes.
# ----------------------------------------------------------------------------
def _batch_tiling(B, max_tile):
    Bp = _round_up(max(B, 1), SUBLANE)
    if Bp <= SUBLANE:
        return Bp, Bp
    target = min(max_tile, _round_up(max(Bp // 2, SUBLANE), SUBLANE))
    target = max(target, SUBLANE)
    n_tiles = _cdiv(Bp, target)
    bt = _round_up(_cdiv(Bp, n_tiles), SUBLANE)    # balance tiles -> low padding
    return bt * n_tiles, bt


# ----------------------------------------------------------------------------
# Forward (jitted, single fused pallas_call)
# ----------------------------------------------------------------------------
@functools.partial(jax.jit, static_argnames=("out_widths", "batch_tile"))
def decoder_forward(ws, b_all, x, *, out_widths, batch_tile=512):
    B, _ = x.shape
    Bp, bt = _batch_tiling(B, batch_tile)
    xp = x if Bp == B else jnp.pad(x, ((0, Bp - B), (0, 0)))
    out = _fused_decoder_call(xp, ws, b_all, out_widths, bt)
    return out if Bp == B else out[:B]


def decoder_reference(params, x):
    n_layers = len(params)
    for idx, (w, b) in enumerate(params):
        x = x @ w + b
        if idx < n_layers - 1:
            x = jnp.maximum(x, 0.0)
    return x


if __name__ == "__main__":
    # Small, forward-consistent shapes.
    batch = 8
    bottleneck_size = 32
    intermediate_architecture = [64, 48]   # decoder goes 32 -> 48 -> 64 -> 16
    output_size = 16

    key = jax.random.PRNGKey(0)
    kp, kx = jax.random.split(key)
    params = init_decoder_params(kp, output_size, intermediate_architecture,
                                 bottleneck_size)
    ws, b_all, out_widths = pad_decoder_params(params)
    x = jax.random.normal(kx, (batch, bottleneck_size), jnp.float32)

    out = decoder_forward(ws, b_all, x, out_widths=out_widths)
    out = jax.block_until_ready(out)

    ref = decoder_reference(params, x)          # f32 reference
    assert out.shape == (batch, output_size)
    # bf16 MXU operands (f32 accumulate) -> loosened tolerance vs f32 reference.
    assert jnp.allclose(out, ref, atol=3e-2, rtol=3e-2), float(
        jnp.max(jnp.abs(out - ref)))

    print("KERNEL_OK")
</pallas_src>

<mosaic_0001>
module attributes {stable_mosaic.version = 11 : i64} {
  func.func @_decoder_kernel(%arg0: i32, %arg1: memref<8x32xf32, #tpu.memory_space<vmem>>, %arg2: memref<32x128xbf16, #tpu.memory_space<vmem>>, %arg3: memref<128x128xbf16, #tpu.memory_space<vmem>>, %arg4: memref<128x16xbf16, #tpu.memory_space<vmem>>, %arg5: memref<3x128xf32, #tpu.memory_space<vmem>>, %arg6: memref<8x16xf32, #tpu.memory_space<vmem>>) attributes {dimension_semantics = [#tpu.dimension_semantics<parallel>], iteration_bounds = array<i64: 1>, scalar_prefetch = 0 : i64, scratch_operands = 0 : i64, tpu.core_type = #tpu.core_type<tc>, window_params = [{transform_indices = @transform_0, window_bounds = array<i64: 8, 32>}, {pipeline_mode = #tpu.pipeline_mode<synchronous>, transform_indices = @transform_1, window_bounds = array<i64: 32, 128>}, {pipeline_mode = #tpu.pipeline_mode<synchronous>, transform_indices = @transform_2, window_bounds = array<i64: 128, 128>}, {pipeline_mode = #tpu.pipeline_mode<synchronous>, transform_indices = @transform_3, window_bounds = array<i64: 128, 16>}, {pipeline_mode = #tpu.pipeline_mode<synchronous>, transform_indices = @transform_4, window_bounds = array<i64: 3, 128>}, {transform_indices = @transform_5, window_bounds = array<i64: 8, 16>}]} {
    %c0 = arith.constant 0 : index
    %c0_0 = arith.constant 0 : index
    %0 = vector.load %arg1[%c0, %c0_0] : memref<8x32xf32, #tpu.memory_space<vmem>>, vector<8x32xf32>
    %c0_1 = arith.constant 0 : index
    %c0_2 = arith.constant 0 : index
    %1 = vector.load %arg2[%c0_1, %c0_2] : memref<32x128xbf16, #tpu.memory_space<vmem>>, vector<32x128xbf16>
    %2 = arith.truncf %0 : vector<8x32xf32> to vector<8x32xbf16>
    %cst = arith.constant dense<0.000000e+00> : vector<8x128xf32>
    %3 = tpu.matmul %2, %1, %cst {dimension_numbers = #tpu.dot_dimension_numbers<[1], [0], [0], [1], [0, 0, 1, 1], [], []>} : vector<8x32xbf16>, vector<32x128xbf16>, vector<8x128xf32> -> vector<8x128xf32>
    %c0_3 = arith.constant 0 : index
    %c0_4 = arith.constant 0 : index
    %4 = vector.load %arg5[%c0_3, %c0_4] : memref<3x128xf32, #tpu.memory_space<vmem>>, vector<1x128xf32>
    %5 = vector.broadcast %4 : vector<1x128xf32> to vector<8x128xf32>
    %6 = arith.addf %3, %5 : vector<8x128xf32>
    %cst_5 = arith.constant 0.000000e+00 : f32
    %7 = vector.broadcast %cst_5 : f32 to vector<8x128xf32>
    %8 = arith.maximumf %6, %7 : vector<8x128xf32>
    %c0_6 = arith.constant 0 : index
    %c0_7 = arith.constant 0 : index
    %9 = vector.load %arg3[%c0_6, %c0_7] : memref<128x128xbf16, #tpu.memory_space<vmem>>, vector<128x128xbf16>
    %10 = arith.truncf %8 : vector<8x128xf32> to vector<8x128xbf16>
    %cst_8 = arith.constant dense<0.000000e+00> : vector<8x128xf32>
    %11 = tpu.matmul %10, %9, %cst_8 {dimension_numbers = #tpu.dot_dimension_numbers<[1], [0], [0], [1], [0, 0, 1, 1], [], []>} : vector<8x128xbf16>, vector<128x128xbf16>, vector<8x128xf32> -> vector<8x128xf32>
    %c1 = arith.constant 1 : index
    %c0_9 = arith.constant 0 : index
    %12 = vector.load %arg5[%c1, %c0_9] : memref<3x128xf32, #tpu.memory_space<vmem>>, vector<1x128xf32>
    %13 = vector.broadcast %12 : vector<1x128xf32> to vector<8x128xf32>
    %14 = arith.addf %11, %13 : vector<8x128xf32>
    %cst_10 = arith.constant 0.000000e+00 : f32
    %15 = vector.broadcast %cst_10 : f32 to vector<8x128xf32>
    %16 = arith.maximumf %14, %15 : vector<8x128xf32>
    %c0_11 = arith.constant 0 : index
    %c0_12 = arith.constant 0 : index
    %17 = vector.load %arg4[%c0_11, %c0_12] : memref<128x16xbf16, #tpu.memory_space<vmem>>, vector<128x16xbf16>
    %18 = arith.truncf %16 : vector<8x128xf32> to vector<8x128xbf16>
    %cst_13 = arith.constant dense<0.000000e+00> : vector<8x16xf32>
    %19 = tpu.matmul %18, %17, %cst_13 {dimension_numbers = #tpu.dot_dimension_numbers<[1], [0], [0], [1], [0, 0, 1, 1], [], []>} : vector<8x128xbf16>, vector<128x16xbf16>, vector<8x16xf32> -> vector<8x16xf32>
    %c2 = arith.constant 2 : index
    %c0_14 = arith.constant 0 : index
    %20 = vector.load %arg5[%c2, %c0_14] : memref<3x128xf32, #tpu.memory_space<vmem>>, vector<1x16xf32>
    %21 = vector.broadcast %20 : vector<1x16xf32> to vector<8x16xf32>
    %22 = arith.addf %19, %21 : vector<8x16xf32>
    %c0_15 = arith.constant 0 : index
    %c0_16 = arith.constant 0 : index
    %23 = vector.load %arg6[%c0_15, %c0_16] : memref<8x16xf32, #tpu.memory_space<vmem>>, vector<8x16xf32>
    tpu.vector_store %arg6[%c0_15, %c0_16], %22 {strides = array<i32>} : memref<8x16xf32, #tpu.memory_space<vmem>>, vector<8x16xf32>,
    return
  }
  func.func @transform_0(%arg0: i32) -> (i32, i32) {
    %c0_i32 = arith.constant 0 : i32
    %c0_i32_0 = arith.constant 0 : i32
    return %arg0, %c0_i32 : i32, i32
  }
  func.func @transform_1(%arg0: i32) -> (i32, i32) {
    %c0_i32 = arith.constant 0 : i32
    %c0_i32_0 = arith.constant 0 : i32
    %c0_i32_1 = arith.constant 0 : i32
    return %c0_i32, %c0_i32_0 : i32, i32
  }
  func.func @transform_2(%arg0: i32) -> (i32, i32) {
    %c0_i32 = arith.constant 0 : i32
    %c0_i32_0 = arith.constant 0 : i32
    %c0_i32_1 = arith.constant 0 : i32
    return %c0_i32, %c0_i32_0 : i32, i32
  }
  func.func @transform_3(%arg0: i32) -> (i32, i32) {
    %c0_i32 = arith.constant 0 : i32
    %c0_i32_0 = arith.constant 0 : i32
    %c0_i32_1 = arith.constant 0 : i32
    return %c0_i32, %c0_i32_0 : i32, i32
  }
  func.func @transform_4(%arg0: i32) -> (i32, i32) {
    %c0_i32 = arith.constant 0 : i32
    %c0_i32_0 = arith.constant 0 : i32
    %c0_i32_1 = arith.constant 0 : i32
    return %c0_i32, %c0_i32_0 : i32, i32
  }
  func.func @transform_5(%arg0: i32) -> (i32, i32) {
    %c0_i32 = arith.constant 0 : i32
    %c0_i32_0 = arith.constant 0 : i32
    return %arg0, %c0_i32 : i32, i32
  }
}

</mosaic_0001>

<bundles_post_ra>
// kernel: decoder_forward.1
= control target key start
LH: loop header
LB: loop body
LE: loop exit
PB: predicated region body
PF: predicated region fallthrough
CT: control target
= control target key end

     0   :  { %10 = vsyncpa [#allocation3], 0  ;;  %s649_s0 = inlined_call_operand.vmem [shape: f32[8,32], index: 0, kind: input, shape index: {}]   ;;  %s650_s1 = inlined_call_operand.hbm [shape: bf16[32,128], index: 1, kind: input, shape index: {}]   ;;  %s651_s2 = inlined_call_operand.vmem [shape: bf16[128,128], index: 2, kind: input, shape index: {}]   ;;  %s652_s3 = inlined_call_operand.vmem [shape: bf16[128,16], index: 3, kind: input, shape index: {}]   ;;  %s653_s4 = inlined_call_operand.vmem [shape: f32[3,128], index: 4, kind: input, shape index: {}]   ;;  %s654_s5 = inlined_call_operand.hbm [shape: f32[8,16], index: 5, kind: output, shape index: {}]  }
   0x1   :  { %11 = vsyncpa [#allocation4], 0  ;;  %s505_s18 = smov [#allocation2]   ;;  %s457_s22 = scalar_lea.hbm %s650_s1, 256 }
   0x2   :  { %s19_s19 = sshll.u32 %s505_s18, 4  ;;  %p458_p0 = scmp.ne.s32.totalorder %s650_s1, %s457_s22  ;;  %s20_s19 = int_to_ptr.vmem [resolvable:$true] %s19_s19 }
   0x3   :  { %p461_p1 = scmp.lt.u32.totalorder %s457_s22, %s650_s1 }
   0x5   :  { %p463_p2 = pnand %p461_p1, %p458_p0 }
   0x7   :  { %466 = shalt.err (!%p463_p2)
}
   0x8   :  { %s467_s27 = scalar_lea.vmem %s20_s19, 256  ;;  %p472_p4 = scmp.lt.s32.totalorder %s20_s19, %s20_s19 }
   0x9   :  { %p468_p3 = scmp.ne.s32.totalorder %s20_s19, %s467_s27  ;;  %p473_p5 = scmp.lt.s32.totalorder %s467_s27, %s467_s27 }
   0xb   :  { %p474_p6 = por %p473_p5, %p472_p4 }
   0xd   :  { %p475_p7 = pnand %p474_p6, %p468_p3 }
   0xf   :  { %478 = shalt.err (!%p475_p7)
}
  0x10   :  { %s506_s28 = smov 64   ;;  %s507_s29 = smov 4  }
  0x11   :  { %25 = dma.hbm_to_vmem [thread:$0]  %s650_s1, 256, %s20_s19, [#allocation3], %s506_s28, %s506_s28, %s507_s29  }
  0x12   :  { %501 = dma.done.wait [#allocation3], 256  }
  0x13   :  { %502 = vsyncadd [#allocation3], 4294967040  ;;  %v508_v0 = vmov 0.0   ;;  %vm509_vm0 = vmmov 0   ;;  %v439_v1 = vld [vmem:[#allocation2] sm:$0xff]   ;;  %v440_v2 = vld [vmem:[#allocation2 + $0x8] sm:$0xff]  }
  0x14   :  { %385 = vmatprep.subr.bf16.mxu0 %v508_v0  ;;  %389 = vmatprep.mubr.msk.bf16.mxu0 %vm509_vm0, %v508_v0  ;;  %v36_v3 = vld [vmem:[%s649_s0] sm:$0xff]  ;;  %v442_v6 = vld [vmem:[%s651_s2 + $0x8] sm:$0xff]   ;;  %vm59_vm1 = vcmask 261120   ;;  %v443_v7 = vld [vmem:[%s651_s2 + $0x10] sm:$0xff]   ;;  %s510_s17 = smov [#allocation5]   ;;  %vm325_vm2 = vcmask 130048  }
  0x15   :  { %393 = vmatprep.subr.bf16.mxu1 %v508_v0  ;;  %409 = vmatprep.mubr.msk.bf16.mxu1 %vm509_vm0, %v508_v0  ;;  %v441_v4 = vld [vmem:[%s651_s2] sm:$0xff]   ;;  %v41_v5 = vpack.c.bf16 %v36_v3, %v36_v3  ;;  %v444_v8 = vld [vmem:[%s651_s2 + $0x18] sm:$0xff]   ;;  %v446_v10 = vld [vmem:[%s651_s2 + $0x28] sm:$0xff]   ;;  %s333_s18 = sshll.u32 %s510_s17, 4  ;;  %s334_s18 = int_to_ptr.vmem [resolvable:$true] %s333_s18 }
  0x16   :  { %386 = vmatpush3.bf16.msra.mxu0 %v439_v1  ;;  %394 = vmatpush3.bf16.msra.mxu1 %v441_v4  ;;  %v445_v9 = vld [vmem:[%s651_s2 + $0x20] sm:$0xff]   ;;  %v447_v11 = vld [vmem:[%s651_s2 + $0x30] sm:$0xff]   ;;  %v448_v12 = vld [vmem:[%s651_s2 + $0x38] sm:$0xff]   ;;  %p484_p9 = scmp.lt.s32.totalorder %s334_s18, %s334_s18 }
  0x17   :  { %387 = vmatprep.subr.bf16.mxu0 %v508_v0  ;;  %395 = vmatprep.subr.bf16.mxu1 %v508_v0  ;;  %v449_v13 = vld [vmem:[%s652_s3] sm:$0xff]   ;;  %v450_v14 = vld [vmem:[%s652_s3 + $0x8] sm:$0xff]   ;;  %v451_v15 = vld [vmem:[%s652_s3 + $0x10] sm:$0xff]  }
  0x18   :  { %v452_v16 = vld [vmem:[%s652_s3 + $0x18] sm:$0xff]   ;;  %v453_v17 = vld [vmem:[%s652_s3 + $0x20] sm:$0xff]   ;;  %v454_v18 = vld [vmem:[%s652_s3 + $0x28] sm:$0xff]  }
  0x19   :  { %v342_v19 = vld [vmem:[%s653_s4] ss:$0 sm:$0xff]  ;;  %v455_v27 = vld [vmem:[%s652_s3 + $0x30] sm:$0xff]   ;;  %v456_v28 = vld [vmem:[%s652_s3 + $0x38] sm:$0xff]   ;;  %s479_s3 = scalar_lea.vmem %s334_s18, 128 }
  0x1a   :  { %388 = vmatpush3.bf16.msra.mxu0 %v440_v2  ;;  %396 = vmatpush3.bf16.msra.mxu1 %v442_v6  ;;  %v346_v29 = vld [vmem:[%s653_s4 + $0x1] ss:$0 sm:$0xff]  ;;  %v355_v37 = vld [vmem:[%s653_s4 + $0x2] ss:$0 sm:$0xff]  ;;  %p480_p8 = scmp.ne.s32.totalorder %s334_s18, %s479_s3  ;;  %p485_p10 = scmp.lt.s32.totalorder %s479_s3, %s479_s3 }
  0x1b   :  { %413 = vmatprep.subr.bf16.mxu0 %v508_v0  ;;  %397 = vmatprep.subr.bf16.mxu1 %v508_v0 }
  0x1c   :  { %p486_p11 = por %p485_p10, %p484_p9 }
  0x1d   :  { %390 = vmatmul.mubr.msk.bf16.vlgmr.msra.gmra.mrb[0].mxu0 %vm59_vm1, %v41_v5 }
  0x1e   :  { %429 = vmatprep.mubr.msk.bf16.mxu0 %vm509_vm0, %v508_v0  ;;  %398 = vmatpush3.bf16.msra.mxu1 %v443_v7  ;;  %p487_p12 = pnand %p486_p11, %p480_p8 }
  0x1f   :  { %399 = vmatprep.subr.bf16.mxu1 %v508_v0  ;;  %414 = vmatpush3.bf16.msra.mxu0 %v449_v13 }
  0x20   :  { %415 = vmatprep.subr.bf16.mxu0 %v508_v0 }
  0x22   :  { %400 = vmatpush3.bf16.msra.mxu1 %v444_v8 }
  0x23   :  { %401 = vmatprep.subr.bf16.mxu1 %v508_v0  ;;  %416 = vmatpush3.bf16.msra.mxu0 %v450_v14 }
  0x24   :  { %417 = vmatprep.subr.bf16.mxu0 %v508_v0 }
  0x26   :  { %402 = vmatpush3.bf16.msra.mxu1 %v445_v9 }
  0x27   :  { %403 = vmatprep.subr.bf16.mxu1 %v508_v0  ;;  %418 = vmatpush3.bf16.msra.mxu0 %v451_v15 }
  0x28   :  { %419 = vmatprep.subr.bf16.mxu0 %v508_v0 }
  0x2a   :  { %404 = vmatpush3.bf16.msra.mxu1 %v446_v10 }
  0x2b   :  { %405 = vmatprep.subr.bf16.mxu1 %v508_v0  ;;  %420 = vmatpush3.bf16.msra.mxu0 %v452_v16 }
  0x2c   :  { %421 = vmatprep.subr.bf16.mxu0 %v508_v0 }
  0x2e   :  { %406 = vmatpush3.bf16.msra.mxu1 %v447_v11 }
  0x2f   :  { %407 = vmatprep.subr.bf16.mxu1 %v508_v0  ;;  %422 = vmatpush3.bf16.msra.mxu0 %v453_v17 }
  0x30   :  { %423 = vmatprep.subr.bf16.mxu0 %v508_v0 }
  0x32   :  { %408 = vmatpush3.bf16.msra.mxu1 %v448_v12 }
  0x33   :  { %424 = vmatpush3.bf16.msra.mxu0 %v454_v18 }
  0x34   :  { %425 = vmatprep.subr.bf16.mxu0 %v508_v0 }
  0x37   :  { %426 = vmatpush3.bf16.msra.mxu0 %v455_v27 }
  0x38   :  { %427 = vmatprep.subr.bf16.mxu0 %v508_v0 }
  0x3b   :  { %428 = vmatpush3.bf16.msra.mxu0 %v456_v28 }
  0xf0   :  { %v97_v20 = vpop.f32.mrb[0].mxu0 }
  0xf1   :  { %v98_v21 = vadd.f32 %v342_v19, %v97_v20  ;;  %v391_v22 = vpop.f32.mrb[1].mxu0 }
  0xf2   :  { %v100_v23 = vpop.f32.mrb[2].mxu0 }
  0xf3   :  { %v103_v24 = vmax.f32 %v98_v21, 0.0  ;;  %v392_v25 = vpop.f32.mrb[3].mxu0 }
  0xf5   :  { %v120_v26 = vpack.c.bf16 %v103_v24, %v103_v24 }
  0xf7   :  { %410 = vmatmul.mubr.bf16.vlgmr.msra.gmra.mrb[0].mxu1 %v120_v26 }
 0x1ca   :  { %v208_v30 = vpop.f32.mrb[0].mxu1 }
 0x1cb   :  { %v209_v31 = vadd.f32 %v346_v29, %v208_v30  ;;  %v411_v32 = vpop.f32.mrb[1].mxu1 }
 0x1cc   :  { %v211_v33 = vpop.f32.mrb[2].mxu1 }
 0x1cd   :  { %v214_v34 = vmax.f32 %v209_v31, 0.0  ;;  %v412_v35 = vpop.f32.mrb[3].mxu1 }
 0x1cf   :  { %v231_v36 = vpack.c.bf16 %v214_v34, %v214_v34 }
 0x1d1   :  { %430 = vmatmul.mubr.bf16.vlgmr.msra.gmra.mrb[4].mxu0 %v231_v36 }
 0x2a4   :  { %v319_v38 = vpop.f32.mrb[4].mxu0 }
 0x2a5   :  { %v320_v39 = vadd.f32 %v355_v37, %v319_v38  ;;  %v431_v40 = vpop.f32.mrb[5].mxu0 }
 0x2a6   :  { %v322_v41 = vpop.f32.mrb[6].mxu0 }
 0x2a7   :  { %v432_v42 = vpop.f32.mrb[7].mxu0  ;;  %326 = vst.msk [vmem:[#allocation5] sm:$0xff] %vm325_vm2, %v320_v39 }
 0x2a8   :  { %490 = shalt.err (!%p487_p12)
}
 0x2a9   :  { %s491_s4 = scalar_lea.hbm %s654_s5, 128 }
 0x2aa   :  { %p492_p13 = scmp.ne.s32.totalorder %s654_s5, %s491_s4  ;;  %p495_p0 = scmp.lt.u32.totalorder %s491_s4, %s654_s5 }
 0x2ac   :  { %p497_p1 = pnand %p495_p0, %p492_p13 }
 0x2ae   :  { %500 = shalt.err (!%p497_p1)
}
 0x2af   :  { %336 = dma.vmem_to_hbm [thread:$0]  %s334_s18, 128, %s654_s5, [#allocation4]  }
 0x2b0   :  { %503 = dma.done.wait [#allocation4], 128  }
 0x2b1   :  { %504 = vsyncadd [#allocation4], 4294967168 }
 0x2b2   :  { %340 = vsyncpa [#allocation3], 1 }
 0x2b3   :  { %341 = vsyncpa [#allocation4], 1 }

</bundles_post_ra>
